<compile_context>
chip_gen: v7x
topology: tpu7x:2x2x1
jax: 0.10.0
libtpu: 0.0.40
codegen_flags: <defaults>
</compile_context>

<pallas_src>
import math

import jax
import jax.numpy as jnp
import numpy as np
from jax.experimental import pallas as pl
from jax.experimental.pallas import tpu as pltpu

EMBED_DIM = 64
NUM_HEADS = 4
HEAD_DIM = EMBED_DIM // NUM_HEADS   # 16
OUT_W = 8                           # narrow output block; heads in lanes [0,4), lanes [4,8) zero
M_TILE_MAX = 2048                   # rows per grid step (double-buffered footprint ~1 MiB)

# Constant head-membership / head-selector matrices (module-level, built once).
_HEAD_ID = np.arange(EMBED_DIM) // HEAD_DIM
BD = np.equal(_HEAD_ID[:, None], _HEAD_ID[None, :]).astype(np.float32)              # (E, E)
SEG = np.equal(_HEAD_ID[:, None], np.arange(OUT_W)[None, :]).astype(np.float32)     # (E, OUT_W)


def _round_up(x, m):
    return (x + m - 1) // m * m


def _pick_tiling(m_rows):
    """Pick (m_tile, m_pad): tiles are multiples of 128; >=2 grid steps once M >= 256."""
    m128 = _round_up(max(m_rows, 1), 128)
    half = (m128 // 2) // 128 * 128          # largest 128-multiple <= m128/2
    m_tile = max(128, min(M_TILE_MAX, half))
    m_pad = _round_up(m128, m_tile)
    return m_tile, m_pad


def _softmax_weighted_sum(q, k, v, bd, seg, o_ref):
    """Shared tail: per-head softmax over Dh and weighted sum, narrow lane-packed store."""
    scores = q * k                                      # 1/sqrt(Dh) already folded into wq/bq
    # Row-wide max over all E lanes (shift-invariant, so identical to per-head max).
    m = jnp.max(scores, axis=-1, keepdims=True)         # (TM, 1)
    p = jnp.exp(scores - m)                             # (TM, E)
    # Per-head denominators via constant block-diagonal matmul (MXU slot).
    denom = jnp.dot(p, bd, preferred_element_type=jnp.float32)       # (TM, E)
    # Guard: if one head's scores sit ~88+ below the row max, its exps underflow to 0;
    # clamp keeps pl.reciprocal finite (that head then outputs 0 instead of NaN).
    denom = jnp.maximum(denom, 1e-30)
    r = pl.reciprocal(denom, approx=True)               # EUP
    r = r * (2.0 - denom * r)                           # one Newton step -> f32 accuracy
    # probs . V reduced per head via constant selector matmul -> (TM, OUT_W), heads in lanes 0..3.
    out = jnp.dot((p * r) * v, seg, preferred_element_type=jnp.float32)
    o_ref[...] = out.astype(o_ref.dtype)


def _mha_self_kernel(x_ref, w_ref, b_ref, bd_ref, seg_ref, o_ref):
    """Self-attention tile: one fused (TM,E)@(E,3E) projection, shared softmax tail."""
    proj = jnp.dot(x_ref[...], w_ref[...], preferred_element_type=jnp.float32) + b_ref[...]
    q = proj[:, 0 * EMBED_DIM:1 * EMBED_DIM]
    k = proj[:, 1 * EMBED_DIM:2 * EMBED_DIM]
    v = proj[:, 2 * EMBED_DIM:3 * EMBED_DIM]
    _softmax_weighted_sum(q, k, v, bd_ref[...], seg_ref[...], o_ref)


def _mha_general_kernel(xq_ref, xk_ref, xv_ref, w_ref, b_ref, bd_ref, seg_ref, o_ref):
    """General q/k/v tile: three real (TM,E)@(E,E) dots against stacked weights."""
    q = jnp.dot(xq_ref[...], w_ref[0], preferred_element_type=jnp.float32) + b_ref[0]
    k = jnp.dot(xk_ref[...], w_ref[1], preferred_element_type=jnp.float32) + b_ref[1]
    v = jnp.dot(xv_ref[...], w_ref[2], preferred_element_type=jnp.float32) + b_ref[2]
    _softmax_weighted_sum(q, k, v, bd_ref[...], seg_ref[...], o_ref)


def prepare_params(params):
    """One-time parameter prep: transpose, fold 1/sqrt(Dh) into wq/bq, fuse/stack."""
    s = 1.0 / math.sqrt(HEAD_DIM)        # 0.25, exact in f32
    wq_t = params["wq"].T * s
    wk_t = params["wk"].T
    wv_t = params["wv"].T
    bq = params["bq"] * s
    bk, bv = params["bk"], params["bv"]
    return {
        "w_fused": jnp.concatenate([wq_t, wk_t, wv_t], axis=1),               # (E, 3E)
        "b_fused": jnp.concatenate([bq, bk, bv]).reshape(1, 3 * EMBED_DIM),   # (1, 3E)
        "w_stack": jnp.stack([wq_t, wk_t, wv_t], axis=0),                     # (3, E, E)
        "b_stack": jnp.stack([bq, bk, bv], axis=0).reshape(3, 1, EMBED_DIM),  # (3, 1, E)
    }


@jax.jit
def _mha_self(x, w_fused, b_fused):
    B, N, E = x.shape
    M = B * N
    m_tile, m_pad = _pick_tiling(M)
    x2d = x.reshape(M, E)
    if m_pad != M:
        x2d = jnp.pad(x2d, ((0, m_pad - M), (0, 0)))

    flops = 2 * m_pad * E * (3 * E + E + OUT_W) + 8 * m_pad * E
    bytes_accessed = 4 * (m_pad * E + m_pad * OUT_W + E * 3 * E + 3 * E + E * E + E * OUT_W)

    out2d = pl.pallas_call(
        _mha_self_kernel,
        out_shape=jax.ShapeDtypeStruct((m_pad, OUT_W), jnp.float32),
        grid_spec=pltpu.PrefetchScalarGridSpec(
            num_scalar_prefetch=0,
            grid=(m_pad // m_tile,),
            in_specs=[
                pl.BlockSpec((m_tile, E), lambda i: (i, 0)),        # activations, M-tiled
                pl.BlockSpec((E, 3 * E), lambda i: (0, 0)),         # fused weight, pinned
                pl.BlockSpec((1, 3 * E), lambda i: (0, 0)),         # fused bias, pinned
                pl.BlockSpec((E, E), lambda i: (0, 0)),             # block-diag selector
                pl.BlockSpec((E, OUT_W), lambda i: (0, 0)),         # head selector
            ],
            out_specs=pl.BlockSpec((m_tile, OUT_W), lambda i: (i, 0)),
        ),
        compiler_params=pltpu.CompilerParams(dimension_semantics=("parallel",)),
        cost_estimate=pl.CostEstimate(
            flops=flops, transcendentals=m_pad * E, bytes_accessed=bytes_accessed),
    )(x2d, w_fused, b_fused, BD, SEG)

    # Narrow (m_pad, 8) array: this slice + reshape fuse under jit and are negligible.
    return out2d[:M, :NUM_HEADS].reshape(B, N, NUM_HEADS)


@jax.jit
def _mha_general(query, key, value, w_stack, b_stack):
    B, N, E = query.shape
    M = B * N
    m_tile, m_pad = _pick_tiling(M)

    def prep(a):
        a2 = a.reshape(M, E)
        if m_pad != M:
            a2 = jnp.pad(a2, ((0, m_pad - M), (0, 0)))
        return a2

    q2d, k2d, v2d = prep(query), prep(key), prep(value)

    flops = 2 * m_pad * E * (3 * E + E + OUT_W) + 8 * m_pad * E
    bytes_accessed = 4 * (3 * m_pad * E + m_pad * OUT_W + 3 * E * E + 3 * E + E * E + E * OUT_W)

    out2d = pl.pallas_call(
        _mha_general_kernel,
        out_shape=jax.ShapeDtypeStruct((m_pad, OUT_W), jnp.float32),
        grid_spec=pltpu.PrefetchScalarGridSpec(
            num_scalar_prefetch=0,
            grid=(m_pad // m_tile,),
            in_specs=[
                pl.BlockSpec((m_tile, E), lambda i: (i, 0)),        # query rows
                pl.BlockSpec((m_tile, E), lambda i: (i, 0)),        # key rows
                pl.BlockSpec((m_tile, E), lambda i: (i, 0)),        # value rows
                pl.BlockSpec((3, E, E), lambda i: (0, 0, 0)),       # stacked weights, pinned
                pl.BlockSpec((3, 1, E), lambda i: (0, 0, 0)),       # stacked biases, pinned
                pl.BlockSpec((E, E), lambda i: (0, 0)),             # block-diag selector
                pl.BlockSpec((E, OUT_W), lambda i: (0, 0)),         # head selector
            ],
            out_specs=pl.BlockSpec((m_tile, OUT_W), lambda i: (i, 0)),
        ),
        compiler_params=pltpu.CompilerParams(dimension_semantics=("parallel",)),
        cost_estimate=pl.CostEstimate(
            flops=flops, transcendentals=m_pad * E, bytes_accessed=bytes_accessed),
    )(q2d, k2d, v2d, w_stack, b_stack, BD, SEG)

    return out2d[:M, :NUM_HEADS].reshape(B, N, NUM_HEADS)


def multi_head_attention(query, key, value, prepared, edge_index=None, edge_weights=None):
    """query/key/value: (B, N, E) float32; `prepared` from prepare_params(). Returns (B, N, H).

    edge_index is accepted but unused (as in the PyTorch forward with edge_weights=None).
    Note: the cheaper self-attention path triggers only when query/key/value are the SAME
    array object (the GraphTransformerLayer case); equal-but-distinct arrays take the
    general 3-input path.
    """
    if edge_weights is not None:
        raise NotImplementedError("TODO(synk): edge_weights forward-hook path not implemented")
    if (query is key) and (key is value):
        return _mha_self(query, prepared["w_fused"], prepared["b_fused"])
    return _mha_general(query, key, value, prepared["w_stack"], prepared["b_stack"])


def _reference(query, key, value, params):
    """Pure-JAX mirror of the PyTorch math for a correctness check."""
    B, N, E = query.shape
    H, Dh = NUM_HEADS, HEAD_DIM
    q = query @ params["wq"].T + params["bq"]
    k = key @ params["wk"].T + params["bk"]
    v = value @ params["wv"].T + params["bv"]
    q = q.reshape(B, N, H, Dh).transpose(0, 2, 1, 3)   # (B, H, N, Dh)
    k = k.reshape(B, N, H, Dh).transpose(0, 2, 1, 3)
    v = v.reshape(B, N, H, Dh).transpose(0, 2, 1, 3)
    scores = (q * k) / math.sqrt(Dh)
    probs = jax.nn.softmax(scores, axis=-1)
    out = jnp.sum(probs * v, axis=-1)                  # (B, H, N)
    return out.transpose(0, 2, 1)                      # (B, N, H)


if __name__ == "__main__":
    root = jax.random.PRNGKey(0)
    keys = jax.random.split(root, 11)

    B, N, E = 2, 10, EMBED_DIM

    query = jax.random.normal(keys[0], (B, N, E), dtype=jnp.float32)
    key_in = jax.random.normal(keys[1], (B, N, E), dtype=jnp.float32)
    value = jax.random.normal(keys[2], (B, N, E), dtype=jnp.float32)
    edge_index = jax.random.randint(keys[3], (2, 20), 0, N)  # unused by the math

    # Deterministic nn.Linear-style init: U(-1/sqrt(in), 1/sqrt(in)), weight (out, in).
    bound = 1.0 / math.sqrt(E)
    params = {
        "wq": jax.random.uniform(keys[4], (E, E), jnp.float32, -bound, bound),
        "wk": jax.random.uniform(keys[5], (E, E), jnp.float32, -bound, bound),
        "wv": jax.random.uniform(keys[6], (E, E), jnp.float32, -bound, bound),
        "bq": jax.random.uniform(keys[7], (E,), jnp.float32, -bound, bound),
        "bk": jax.random.uniform(keys[8], (E,), jnp.float32, -bound, bound),
        "bv": jax.random.uniform(keys[9], (E,), jnp.float32, -bound, bound),
    }
    prepared = prepare_params(params)   # one-time weight prep (transpose / scale-fold / stack)

    # General (distinct query/key/value) path.
    out = jax.block_until_ready(
        multi_head_attention(query, key_in, value, prepared, edge_index))
    ref = _reference(query, key_in, value, params)
    assert out.shape == (B, N, NUM_HEADS), out.shape
    assert jnp.allclose(out, ref, atol=1e-5, rtol=1e-5), float(jnp.max(jnp.abs(out - ref)))

    # Self-attention path (what GraphTransformerLayer actually uses: q = k = v = x).
    x = jax.random.normal(keys[10], (B, N, E), dtype=jnp.float32)
    out_self = jax.block_until_ready(multi_head_attention(x, x, x, prepared, edge_index))
    ref_self = _reference(x, x, x, params)
    assert out_self.shape == (B, N, NUM_HEADS), out_self.shape
    assert jnp.allclose(out_self, ref_self, atol=1e-5, rtol=1e-5), \
        float(jnp.max(jnp.abs(out_self - ref_self)))

    print("KERNEL_OK")
</pallas_src>

<mosaic_0001>
module attributes {stable_mosaic.version = 11 : i64} {
  func.func @_mha_general_kernel(%arg0: i32, %arg1: memref<128x64xf32, #tpu.memory_space<vmem>>, %arg2: memref<128x64xf32, #tpu.memory_space<vmem>>, %arg3: memref<128x64xf32, #tpu.memory_space<vmem>>, %arg4: memref<3x64x64xf32, #tpu.memory_space<vmem>>, %arg5: memref<3x1x64xf32, #tpu.memory_space<vmem>>, %arg6: memref<64x64xf32, #tpu.memory_space<vmem>>, %arg7: memref<64x8xf32, #tpu.memory_space<vmem>>, %arg8: memref<128x8xf32, #tpu.memory_space<vmem>>) attributes {dimension_semantics = [#tpu.dimension_semantics<parallel>], iteration_bounds = array<i64: 1>, scalar_prefetch = 0 : i64, scratch_operands = 0 : i64, tpu.core_type = #tpu.core_type<tc>, window_params = [{transform_indices = @transform_0, window_bounds = array<i64: 128, 64>}, {transform_indices = @transform_1, window_bounds = array<i64: 128, 64>}, {transform_indices = @transform_2, window_bounds = array<i64: 128, 64>}, {pipeline_mode = #tpu.pipeline_mode<synchronous>, transform_indices = @transform_3, window_bounds = array<i64: 3, 64, 64>}, {pipeline_mode = #tpu.pipeline_mode<synchronous>, transform_indices = @transform_4, window_bounds = array<i64: 3, 1, 64>}, {pipeline_mode = #tpu.pipeline_mode<synchronous>, transform_indices = @transform_5, window_bounds = array<i64: 64, 64>}, {pipeline_mode = #tpu.pipeline_mode<synchronous>, transform_indices = @transform_6, window_bounds = array<i64: 64, 8>}, {transform_indices = @transform_7, window_bounds = array<i64: 128, 8>}]} {
    %c0 = arith.constant 0 : index
    %c0_0 = arith.constant 0 : index
    %0 = vector.load %arg1[%c0, %c0_0] : memref<128x64xf32, #tpu.memory_space<vmem>>, vector<128x64xf32>
    %c0_1 = arith.constant 0 : index
    %c0_2 = arith.constant 0 : index
    %c0_3 = arith.constant 0 : index
    %1 = vector.load %arg4[%c0_1, %c0_2, %c0_3] : memref<3x64x64xf32, #tpu.memory_space<vmem>>, vector<1x64x64xf32>
    %2 = vector.shape_cast %1 : vector<1x64x64xf32> to vector<64x64xf32>
    %cst = arith.constant dense<0.000000e+00> : vector<128x64xf32>
    %3 = tpu.matmul %0, %2, %cst {dimension_numbers = #tpu.dot_dimension_numbers<[1], [0], [0], [1], [0, 0, 1, 1], [], []>} : vector<128x64xf32>, vector<64x64xf32>, vector<128x64xf32> -> vector<128x64xf32>
    %c0_4 = arith.constant 0 : index
    %c0_5 = arith.constant 0 : index
    %c0_6 = arith.constant 0 : index
    %4 = vector.load %arg5[%c0_4, %c0_5, %c0_6] : memref<3x1x64xf32, #tpu.memory_space<vmem>>, vector<1x1x64xf32>
    %5 = vector.shape_cast %4 : vector<1x1x64xf32> to vector<1x64xf32>
    %6 = vector.broadcast %5 : vector<1x64xf32> to vector<128x64xf32>
    %7 = arith.addf %3, %6 : vector<128x64xf32>
    %c0_7 = arith.constant 0 : index
    %c0_8 = arith.constant 0 : index
    %8 = vector.load %arg2[%c0_7, %c0_8] : memref<128x64xf32, #tpu.memory_space<vmem>>, vector<128x64xf32>
    %c1 = arith.constant 1 : index
    %c0_9 = arith.constant 0 : index
    %c0_10 = arith.constant 0 : index
    %9 = vector.load %arg4[%c1, %c0_9, %c0_10] : memref<3x64x64xf32, #tpu.memory_space<vmem>>, vector<1x64x64xf32>
    %10 = vector.shape_cast %9 : vector<1x64x64xf32> to vector<64x64xf32>
    %cst_11 = arith.constant dense<0.000000e+00> : vector<128x64xf32>
    %11 = tpu.matmul %8, %10, %cst_11 {dimension_numbers = #tpu.dot_dimension_numbers<[1], [0], [0], [1], [0, 0, 1, 1], [], []>} : vector<128x64xf32>, vector<64x64xf32>, vector<128x64xf32> -> vector<128x64xf32>
    %c1_12 = arith.constant 1 : index
    %c0_13 = arith.constant 0 : index
    %c0_14 = arith.constant 0 : index
    %12 = vector.load %arg5[%c1_12, %c0_13, %c0_14] : memref<3x1x64xf32, #tpu.memory_space<vmem>>, vector<1x1x64xf32>
    %13 = vector.shape_cast %12 : vector<1x1x64xf32> to vector<1x64xf32>
    %14 = vector.broadcast %13 : vector<1x64xf32> to vector<128x64xf32>
    %15 = arith.addf %11, %14 : vector<128x64xf32>
    %c0_15 = arith.constant 0 : index
    %c0_16 = arith.constant 0 : index
    %16 = vector.load %arg3[%c0_15, %c0_16] : memref<128x64xf32, #tpu.memory_space<vmem>>, vector<128x64xf32>
    %c2 = arith.constant 2 : index
    %c0_17 = arith.constant 0 : index
    %c0_18 = arith.constant 0 : index
    %17 = vector.load %arg4[%c2, %c0_17, %c0_18] : memref<3x64x64xf32, #tpu.memory_space<vmem>>, vector<1x64x64xf32>
    %18 = vector.shape_cast %17 : vector<1x64x64xf32> to vector<64x64xf32>
    %cst_19 = arith.constant dense<0.000000e+00> : vector<128x64xf32>
    %19 = tpu.matmul %16, %18, %cst_19 {dimension_numbers = #tpu.dot_dimension_numbers<[1], [0], [0], [1], [0, 0, 1, 1], [], []>} : vector<128x64xf32>, vector<64x64xf32>, vector<128x64xf32> -> vector<128x64xf32>
    %c2_20 = arith.constant 2 : index
    %c0_21 = arith.constant 0 : index
    %c0_22 = arith.constant 0 : index
    %20 = vector.load %arg5[%c2_20, %c0_21, %c0_22] : memref<3x1x64xf32, #tpu.memory_space<vmem>>, vector<1x1x64xf32>
    %21 = vector.shape_cast %20 : vector<1x1x64xf32> to vector<1x64xf32>
    %22 = vector.broadcast %21 : vector<1x64xf32> to vector<128x64xf32>
    %23 = arith.addf %19, %22 : vector<128x64xf32>
    %c0_23 = arith.constant 0 : index
    %c0_24 = arith.constant 0 : index
    %24 = vector.load %arg6[%c0_23, %c0_24] : memref<64x64xf32, #tpu.memory_space<vmem>>, vector<64x64xf32>
    %c0_25 = arith.constant 0 : index
    %c0_26 = arith.constant 0 : index
    %25 = vector.load %arg7[%c0_25, %c0_26] : memref<64x8xf32, #tpu.memory_space<vmem>>, vector<64x8xf32>
    %26 = arith.mulf %7, %15 : vector<128x64xf32>
    %cst_27 = arith.constant dense<0xFF800000> : vector<128xf32>
    %27 = vector.multi_reduction <maximumf>, %26, %cst_27 [1] : vector<128x64xf32> to vector<128xf32>
    %28 = vector.shape_cast %27 : vector<128xf32> to vector<128x1xf32>
    %29 = vector.broadcast %28 : vector<128x1xf32> to vector<128x64xf32>
    %30 = arith.subf %26, %29 : vector<128x64xf32>
    %31 = math.exp %30 : vector<128x64xf32>
    %cst_28 = arith.constant dense<0.000000e+00> : vector<128x64xf32>
    %32 = tpu.matmul %31, %24, %cst_28 {dimension_numbers = #tpu.dot_dimension_numbers<[1], [0], [0], [1], [0, 0, 1, 1], [], []>} : vector<128x64xf32>, vector<64x64xf32>, vector<128x64xf32> -> vector<128x64xf32>
    %cst_29 = arith.constant 1.000000e-30 : f32
    %33 = vector.broadcast %cst_29 : f32 to vector<128x64xf32>
    %34 = arith.maximumf %32, %33 : vector<128x64xf32>
    %35 = tpu.reciprocal %34 {approx = true} : vector<128x64xf32> -> vector<128x64xf32>
    %36 = arith.mulf %34, %35 : vector<128x64xf32>
    %cst_30 = arith.constant 2.000000e+00 : f32
    %37 = vector.broadcast %cst_30 : f32 to vector<128x64xf32>
    %38 = arith.subf %37, %36 : vector<128x64xf32>
    %39 = arith.mulf %35, %38 : vector<128x64xf32>
    %40 = arith.mulf %31, %39 : vector<128x64xf32>
    %41 = arith.mulf %40, %23 : vector<128x64xf32>
    %cst_31 = arith.constant dense<0.000000e+00> : vector<128x8xf32>
    %42 = tpu.matmul %41, %25, %cst_31 {dimension_numbers = #tpu.dot_dimension_numbers<[1], [0], [0], [1], [0, 0, 1, 1], [], []>} : vector<128x64xf32>, vector<64x8xf32>, vector<128x8xf32> -> vector<128x8xf32>
    %c0_32 = arith.constant 0 : index
    %c0_33 = arith.constant 0 : index
    %43 = vector.load %arg8[%c0_32, %c0_33] : memref<128x8xf32, #tpu.memory_space<vmem>>, vector<128x8xf32>
    tpu.vector_store %arg8[%c0_32, %c0_33], %42 {strides = array<i32>} : memref<128x8xf32, #tpu.memory_space<vmem>>, vector<128x8xf32>,
    return
  }
  func.func @transform_0(%arg0: i32) -> (i32, i32) {
    %c0_i32 = arith.constant 0 : i32
    %c0_i32_0 = arith.constant 0 : i32
    return %arg0, %c0_i32 : i32, i32
  }
  func.func @transform_1(%arg0: i32) -> (i32, i32) {
    %c0_i32 = arith.constant 0 : i32
    %c0_i32_0 = arith.constant 0 : i32
    return %arg0, %c0_i32 : i32, i32
  }
  func.func @transform_2(%arg0: i32) -> (i32, i32) {
    %c0_i32 = arith.constant 0 : i32
    %c0_i32_0 = arith.constant 0 : i32
    return %arg0, %c0_i32 : i32, i32
  }
  func.func @transform_3(%arg0: i32) -> (i32, i32, i32) {
    %c0_i32 = arith.constant 0 : i32
    %c0_i32_0 = arith.constant 0 : i32
    %c0_i32_1 = arith.constant 0 : i32
    %c0_i32_2 = arith.constant 0 : i32
    return %c0_i32, %c0_i32_0, %c0_i32_1 : i32, i32, i32
  }
  func.func @transform_4(%arg0: i32) -> (i32, i32, i32) {
    %c0_i32 = arith.constant 0 : i32
    %c0_i32_0 = arith.constant 0 : i32
    %c0_i32_1 = arith.constant 0 : i32
    %c0_i32_2 = arith.constant 0 : i32
    return %c0_i32, %c0_i32_0, %c0_i32_1 : i32, i32, i32
  }
  func.func @transform_5(%arg0: i32) -> (i32, i32) {
    %c0_i32 = arith.constant 0 : i32
    %c0_i32_0 = arith.constant 0 : i32
    %c0_i32_1 = arith.constant 0 : i32
    return %c0_i32, %c0_i32_0 : i32, i32
  }
  func.func @transform_6(%arg0: i32) -> (i32, i32) {
    %c0_i32 = arith.constant 0 : i32
    %c0_i32_0 = arith.constant 0 : i32
    %c0_i32_1 = arith.constant 0 : i32
    return %c0_i32, %c0_i32_0 : i32, i32
  }
  func.func @transform_7(%arg0: i32) -> (i32, i32) {
    %c0_i32 = arith.constant 0 : i32
    %c0_i32_0 = arith.constant 0 : i32
    return %arg0, %c0_i32 : i32, i32
  }
}

</mosaic_0001>

<bundles_post_ra>
// kernel: _mha_general.1
= control target key start
LH: loop header
LB: loop body
LE: loop exit
PB: predicated region body
PF: predicated region fallthrough
CT: control target
= control target key end

     0   :  { %vm57_vm0 = vcmask 523264   ;;  %vm1329_vm1 = vcmask 64512   ;;  %s2678_s3 = inlined_call_operand.vmem [shape: f32[3,64,64], index: 3, kind: input, shape index: {}]   ;;  %s2679_s0 = inlined_call_operand.vmem [shape: f32[128,64], index: 0, kind: input, shape index: {}]   ;;  %s2680_s1 = inlined_call_operand.vmem [shape: f32[128,64], index: 1, kind: input, shape index: {}]   ;;  %s2681_s5 = inlined_call_operand.vmem [shape: f32[64,64], index: 5, kind: input, shape index: {}]   ;;  %s2682_s4 = inlined_call_operand.vmem [shape: f32[3,1,64], index: 4, kind: input, shape index: {}]   ;;  %s2683_s2 = inlined_call_operand.vmem [shape: f32[128,64], index: 2, kind: input, shape index: {}]   ;;  %s2684_s6 = inlined_call_operand.vmem [shape: f32[64,8], index: 6, kind: input, shape index: {}]   ;;  %s2685_s7 = inlined_call_operand.vmem [shape: f32[128,8], index: 7, kind: output, shape index: {}]  }
   0x1   :  { %v42_v0 = vld [vmem:[%s2678_s3] sm:$0xff]  ;;  %v43_v1 = vld [vmem:[%s2678_s3 + $0x8] sm:$0xff]  ;;  %v44_v2 = vld [vmem:[%s2678_s3 + $0x10] sm:$0xff] }
   0x2   :  { %v1771_v3 = vpack.c.bf16 %v43_v1, %v42_v0  ;;  %v45_v4 = vld [vmem:[%s2678_s3 + $0x18] sm:$0xff]  ;;  %v46_v6 = vld [vmem:[%s2678_s3 + $0x20] sm:$0xff]  ;;  %v47_v7 = vld [vmem:[%s2678_s3 + $0x28] sm:$0xff] }
   0x3   :  { %v1775_v5 = vpack.c.bf16 %v45_v4, %v44_v2  ;;  %v34_v8 = vld [vmem:[%s2679_s0 + $0x40] sm:$0xff]  ;;  %v1779_v9 = vpack.c.bf16 %v47_v7, %v46_v6  ;;  %v48_v10 = vld [vmem:[%s2678_s3 + $0x30] sm:$0xff]  ;;  %v49_v11 = vld [vmem:[%s2678_s3 + $0x38] sm:$0xff] }
   0x4   :  { %1851 = vmatprep.subr.bf16.mxu1 %v1771_v3  ;;  %1599 = vmatprep.mubr.msk.f32.mxu1 %vm57_vm0, %v34_v8  ;;  %v26_v12 = vld [vmem:[%s2679_s0] sm:$0xff]  ;;  %v1783_v13 = vpack.c.bf16 %v49_v11, %v48_v10  ;;  %v1368_v15 = vld [vmem:[%s2678_s3 + $0x48] sm:$0xff]  ;;  %v1369_v17 = vld [vmem:[%s2678_s3 + $0x50] sm:$0xff] }
   0x5   :  { %1855 = vmatpush3.bf16.msra.mxu1 %v1771_v3  ;;  %1772 = vmatprep.subr.bf16.mxu0 %v1771_v3  ;;  %v1367_v14 = vld [vmem:[%s2678_s3 + $0x40] sm:$0xff]  ;;  %v1370_v18 = vld [vmem:[%s2678_s3 + $0x58] sm:$0xff]  ;;  %v35_v19 = vld [vmem:[%s2679_s0 + $0x48] sm:$0xff] }
   0x6   :  { %1852 = vmatprep.subr.bf16.mxu1 %v1775_v5  ;;  %1774 = vmatpush3.bf16.msra.mxu0 %v1771_v3  ;;  %v1787_v16 = vpack.c.bf16 %v1368_v15, %v1367_v14  ;;  %v36_v20 = vld [vmem:[%s2679_s0 + $0x50] sm:$0xff]  ;;  %v1791_v21 = vpack.c.bf16 %v1370_v18, %v1369_v17  ;;  %v1371_v22 = vld [vmem:[%s2678_s3 + $0x60] sm:$0xff]  ;;  %v1372_v23 = vld [vmem:[%s2678_s3 + $0x68] sm:$0xff] }
   0x7   :  { %1776 = vmatprep.subr.bf16.mxu0 %v1775_v5  ;;  %1587 = vmatprep.mubr.msk.f32.mxu0 %vm57_vm0, %v26_v12  ;;  %v27_v24 = vld [vmem:[%s2679_s0 + $0x8] sm:$0xff]  ;;  %v28_v25 = vld [vmem:[%s2679_s0 + $0x10] sm:$0xff]  ;;  %v37_v26 = vld [vmem:[%s2679_s0 + $0x58] sm:$0xff]  ;;  %v1795_v28 = vpack.c.bf16 %v1372_v23, %v1371_v22 }
   0x8   :  { %v38_v27 = vld [vmem:[%s2679_s0 + $0x60] sm:$0xff]  ;;  %v1373_v29 = vld [vmem:[%s2678_s3 + $0x70] sm:$0xff]  ;;  %v1374_v30 = vld [vmem:[%s2678_s3 + $0x78] sm:$0xff] }
   0x9   :  { %1856 = vmatpush3.bf16.msra.mxu1 %v1775_v5  ;;  %v29_v31 = vld [vmem:[%s2679_s0 + $0x18] sm:$0xff]  ;;  %v30_v32 = vld [vmem:[%s2679_s0 + $0x20] sm:$0xff]  ;;  %v39_v33 = vld [vmem:[%s2679_s0 + $0x68] sm:$0xff]  ;;  %v1799_v35 = vpack.c.bf16 %v1374_v30, %v1373_v29 }
   0xa   :  { %1853 = vmatprep.subr.bf16.mxu1 %v1779_v9  ;;  %1778 = vmatpush3.bf16.msra.mxu0 %v1775_v5  ;;  %v40_v34 = vld [vmem:[%s2679_s0 + $0x70] sm:$0xff]  ;;  %v31_v36 = vld [vmem:[%s2679_s0 + $0x28] sm:$0xff]  ;;  %v41_v38 = vld [vmem:[%s2679_s0 + $0x78] sm:$0xff] }
   0xb   :  { %1780 = vmatprep.subr.bf16.mxu0 %v1779_v9  ;;  %v32_v37 = vld [vmem:[%s2679_s0 + $0x30] sm:$0xff]  ;;  %v251_v39 = vld [vmem:[%s2680_s1] sm:$0xff]  ;;  %v33_v40 = vld [vmem:[%s2679_s0 + $0x38] sm:$0xff] }
   0xc   :  { %v252_v41 = vld [vmem:[%s2680_s1 + $0x8] sm:$0xff]  ;;  %v253_v42 = vld [vmem:[%s2680_s1 + $0x10] sm:$0xff]  ;;  %v254_v43 = vld [vmem:[%s2680_s1 + $0x18] sm:$0xff] }
   0xd   :  { %1857 = vmatpush3.bf16.msra.mxu1 %v1779_v9  ;;  %v255_v44 = vld [vmem:[%s2680_s1 + $0x20] sm:$0xff]  ;;  %v256_v45 = vld [vmem:[%s2680_s1 + $0x28] sm:$0xff]  ;;  %v257_v46 = vld [vmem:[%s2680_s1 + $0x30] sm:$0xff] }
   0xe   :  { %1854 = vmatprep.subr.bf16.mxu1 %v1783_v13  ;;  %1782 = vmatpush3.bf16.msra.mxu0 %v1779_v9  ;;  %v258_v47 = vld [vmem:[%s2680_s1 + $0x38] sm:$0xff]  ;;  %v259_v48 = vld [vmem:[%s2680_s1 + $0x40] sm:$0xff]  ;;  %v260_v49 = vld [vmem:[%s2680_s1 + $0x48] sm:$0xff] }
   0xf   :  { %1784 = vmatprep.subr.bf16.mxu0 %v1783_v13  ;;  %v261_v50 = vld [vmem:[%s2680_s1 + $0x50] sm:$0xff]  ;;  %v262_v51 = vld [vmem:[%s2680_s1 + $0x58] sm:$0xff]  ;;  %v263_v52 = vld [vmem:[%s2680_s1 + $0x60] sm:$0xff] }
  0x10   :  { %v264_v53 = vld [vmem:[%s2680_s1 + $0x68] sm:$0xff]  ;;  %v265_v54 = vld [vmem:[%s2680_s1 + $0x70] sm:$0xff]  ;;  %v266_v55 = vld [vmem:[%s2680_s1 + $0x78] sm:$0xff] }
  0x11   :  { %1858 = vmatpush3.bf16.msra.mxu1 %v1783_v13  ;;  %v703_v56 = vld [vmem:[%s2681_s5] sm:$0xff]  ;;  %v704_v57 = vld [vmem:[%s2681_s5 + $0x8] sm:$0xff]  ;;  %v705_v58 = vld [vmem:[%s2681_s5 + $0x10] sm:$0xff] }
  0x12   :  { %1788 = vmatprep.subr.bf16.mxu1 %v1787_v16  ;;  %1786 = vmatpush3.bf16.msra.mxu0 %v1783_v13  ;;  %v1819_v59 = vpack.c.bf16 %v704_v57, %v703_v56  ;;  %v706_v60 = vld [vmem:[%s2681_s5 + $0x18] sm:$0xff]  ;;  %v2168_v12 = vld [vmem:[%s2682_s4] ss:$0 sm:$0xff]  ;;  %v2173_v13 = vld [vmem:[%s2682_s4 + $0x1] ss:$0 sm:$0xff] }
  0x13   :  { %v1823_v61 = vpack.c.bf16 %v706_v60, %v705_v58 }
  0x14   :  { %1600 = vmatmul.mubr.msk.f32.vlgmr.msra.gmra.mrb[0].mxu1 %vm57_vm0, %v35_v19 }
  0x15   :  { %1790 = vmatpush3.bf16.msra.mxu1 %v1787_v16  ;;  %1602 = vmatprep.mubr.msk.f32.mxu1 %vm57_vm0, %v36_v20 }
  0x16   :  { %1792 = vmatprep.subr.bf16.mxu1 %v1791_v21  ;;  %1588 = vmatmul.mubr.msk.f32.vlgmr.msra.gmra.mrb[0].mxu0 %vm57_vm0, %v27_v24 }
  0x17   :  { %1590 = vmatprep.mubr.msk.f32.mxu0 %vm57_vm0, %v28_v25 }
  0x18   :  { %1603 = vmatmul.mubr.msk.f32.gmra.mrb[2].mxu1 %vm57_vm0, %v37_v26 }
  0x19   :  { %1794 = vmatpush3.bf16.msra.mxu1 %v1791_v21  ;;  %1605 = vmatprep.mubr.msk.f32.mxu1 %vm57_vm0, %v38_v27 }
  0x1a   :  { %1796 = vmatprep.subr.bf16.mxu1 %v1795_v28  ;;  %1591 = vmatmul.mubr.msk.f32.gmra.mrb[2].mxu0 %vm57_vm0, %v29_v31 }
  0x1b   :  { %1593 = vmatprep.mubr.msk.f32.mxu0 %vm57_vm0, %v30_v32 }
  0x1c   :  { %1606 = vmatmul.mubr.msk.f32.gmra.mrb[4].mxu1 %vm57_vm0, %v39_v33 }
  0x1d   :  { %1798 = vmatpush3.bf16.msra.mxu1 %v1795_v28  ;;  %1608 = vmatprep.mubr.msk.f32.mxu1 %vm57_vm0, %v40_v34 }
  0x1e   :  { %1800 = vmatprep.subr.bf16.mxu1 %v1799_v35  ;;  %1594 = vmatmul.mubr.msk.f32.gmra.mrb[4].mxu0 %vm57_vm0, %v31_v36 }
  0x1f   :  { %1596 = vmatprep.mubr.msk.f32.mxu0 %vm57_vm0, %v32_v37 }
  0x20   :  { %1609 = vmatmul.mubr.msk.f32.gmra.mrb[6].mxu1 %vm57_vm0, %v41_v38 }
  0x21   :  { %1802 = vmatpush3.bf16.msra.mxu1 %v1799_v35  ;;  %1627 = vmatprep.mubr.msk.f32.mxu1 %vm57_vm0, %v251_v39 }
  0x22   :  { %1597 = vmatmul.mubr.msk.f32.gmra.mrb[6].mxu0 %vm57_vm0, %v33_v40  ;;  %1820 = vmatprep.subr.bf16.mxu1 %v1819_v59 }
  0x24   :  { %1628 = vmatmul.mubr.msk.f32.vlgmr.msra.gmra.mrb[8].mxu1 %vm57_vm0, %v252_v41 }
  0x25   :  { %1630 = vmatprep.mubr.msk.f32.mxu1 %vm57_vm0, %v253_v42  ;;  %1822 = vmatpush3.bf16.msra.mxu1 %v1819_v59 }
  0x26   :  { %1824 = vmatprep.subr.bf16.mxu1 %v1823_v61 }
  0x28   :  { %1631 = vmatmul.mubr.msk.f32.gmra.mrb[10].mxu1 %vm57_vm0, %v254_v43 }
  0x29   :  { %1633 = vmatprep.mubr.msk.f32.mxu1 %vm57_vm0, %v255_v44  ;;  %1826 = vmatpush3.bf16.msra.mxu1 %v1823_v61 }
  0x2c   :  { %1634 = vmatmul.mubr.msk.f32.gmra.mrb[12].mxu1 %vm57_vm0, %v256_v45 }
  0x2d   :  { %1636 = vmatprep.mubr.msk.f32.mxu1 %vm57_vm0, %v257_v46 }
  0x30   :  { %1637 = vmatmul.mubr.msk.f32.gmra.mrb[14].mxu1 %vm57_vm0, %v258_v47 }
  0x31   :  { %1639 = vmatprep.mubr.msk.f32.mxu1 %vm57_vm0, %v259_v48 }
  0x34   :  { %1640 = vmatmul.mubr.msk.f32.gmra.mrb[16].mxu1 %vm57_vm0, %v260_v49 }
  0x35   :  { %1642 = vmatprep.mubr.msk.f32.mxu1 %vm57_vm0, %v261_v50 }
  0x38   :  { %1643 = vmatmul.mubr.msk.f32.gmra.mrb[18].mxu1 %vm57_vm0, %v262_v51 }
  0x39   :  { %1645 = vmatprep.mubr.msk.f32.mxu1 %vm57_vm0, %v263_v52 }
  0x3c   :  { %1646 = vmatmul.mubr.msk.f32.gmra.mrb[20].mxu1 %vm57_vm0, %v264_v53 }
  0x3d   :  { %1648 = vmatprep.mubr.msk.f32.mxu1 %vm57_vm0, %v265_v54 }
  0x40   :  { %1649 = vmatmul.mubr.msk.f32.gmra.mrb[22].mxu1 %vm57_vm0, %v266_v55 }
  0xe7   :  { %v1601_v62 = vpop.f32.mrb[0].mxu1 }
  0xe8   :  { %v2151_v63 = vpop.f32.mrb[1].mxu1  ;;  %v218_v54 = vadd.f32 %v1601_v62, %v2168_v12 }
  0xe9   :  { %v1589_v0 = vpop.f32.mrb[0].mxu0  ;;  %v213_v57 = vadd.f32 %v2168_v12, %v2151_v63 }
  0xea   :  { %v172_v1 = vpop.f32.mrb[1].mxu0  ;;  %v178_v15 = vadd.f32 %v1589_v0, %v2168_v12 }
  0xeb   :  { %v2153_v2 = vpop.f32.mrb[2].mxu1  ;;  %v173_v18 = vadd.f32 %v2168_v12, %v172_v1 }
  0xec   :  { %v2155_v3 = vpop.f32.mrb[3].mxu1  ;;  %v228_v1 = vadd.f32 %v2153_v2, %v2168_v12 }
  0xed   :  { %v1592_v4 = vpop.f32.mrb[2].mxu0 }
  0xee   :  { %v182_v5 = vpop.f32.mrb[3].mxu0  ;;  %v188_v22 = vadd.f32 %v1592_v4, %v2168_v12 }
  0xef   :  { %v2157_v6 = vpop.f32.mrb[4].mxu1  ;;  %v183_v25 = vadd.f32 %v2168_v12, %v182_v5  ;;  %v223_v5 = vadd.f32 %v2168_v12, %v2155_v3 }
  0xf0   :  { %v2159_v7 = vpop.f32.mrb[5].mxu1 }
  0xf1   :  { %v1595_v8 = vpop.f32.mrb[4].mxu0  ;;  %v233_v3 = vadd.f32 %v2168_v12, %v2159_v7 }
  0xf2   :  { %v192_v9 = vpop.f32.mrb[5].mxu0  ;;  %v198_v31 = vadd.f32 %v1595_v8, %v2168_v12 }
  0xf3   :  { %v2161_v10 = vpop.f32.mrb[6].mxu1  ;;  %v193_v34 = vadd.f32 %v2168_v12, %v192_v9 }
  0xf4   :  { %v2163_v11 = vpop.f32.mrb[7].mxu1 }
  0xf5   :  { %v1598_v14 = vpop.f32.mrb[6].mxu0 }
  0xf6   :  { %v202_v16 = vpop.f32.mrb[7].mxu0  ;;  %v208_v41 = vadd.f32 %v1598_v14, %v2168_v12 }
  0xf7   :  { %v1629_v17 = vpop.f32.mrb[8].mxu1  ;;  %v203_v44 = vadd.f32 %v2168_v12, %v202_v16 }
  0xf8   :  { %v404_v19 = vadd.f32 %v1629_v17, %v2173_v13  ;;  %v398_v20 = vpop.f32.mrb[9].mxu1  ;;  %v238_v17 = vadd.f32 %v2157_v6, %v2168_v12 }
  0xf9   :  { %v399_v21 = vadd.f32 %v2173_v13, %v398_v20  ;;  %v707_v20 = vld [vmem:[%s2681_s5 + $0x20] sm:$0xff] }
  0xfa   :  { %v2180_v23 = vmul.f32 %v404_v19, %v178_v15 }
  0xfb   :  { %v1632_v24 = vpop.f32.mrb[10].mxu1  ;;  %v2183_v26 = vmul.f32 %v399_v21, %v173_v18  ;;  %v708_v21 = vld [vmem:[%s2681_s5 + $0x28] sm:$0xff] }
  0xfc   :  { %v414_v27 = vadd.f32 %v1632_v24, %v2173_v13  ;;  %v408_v28 = vpop.f32.mrb[11].mxu1  ;;  %v738_v40 = vsel %vm57_vm0, %v2180_v23, -inf  ;;  %v1827_v7 = vpack.c.bf16 %v708_v21, %v707_v20  ;;  %v490_v20 = vld [vmem:[%s2683_s2 + $0x68] sm:$0xff]  ;;  %v491_v21 = vld [vmem:[%s2683_s2 + $0x70] sm:$0xff] }
  0xfd   :  { %v409_v29 = vadd.f32 %v2173_v13, %v408_v28  ;;  %v735_v30 = vsel %vm57_vm0, %v2183_v26, -inf }
  0xfe   :  { %736 = vmax.xlane.f32.xlu0 %v735_v30  ;;  %v2190_v32 = vmul.f32 %v414_v27, %v188_v22  ;;  %1828 = vmatprep.subr.bf16.mxu1 %v1827_v7 }
  0xff   :  { %v1635_v33 = vpop.f32.mrb[12].mxu1  ;;  %v2193_v35 = vmul.f32 %v409_v29, %v183_v25  ;;  %v248_v29 = vadd.f32 %v2161_v10, %v2168_v12  ;;  %1830 = vmatpush3.bf16.msra.mxu1 %v1827_v7 }
 0x100   :  { %v424_v36 = vadd.f32 %v1635_v33, %v2173_v13  ;;  %v418_v37 = vpop.f32.mrb[13].mxu1  ;;  %v744_v49 = vsel %vm57_vm0, %v2190_v32, -inf  ;;  %v243_v33 = vadd.f32 %v2168_v12, %v2163_v11  ;;  %v709_v12 = vld [vmem:[%s2681_s5 + $0x30] sm:$0xff] }
 0x101   :  { %v419_v38 = vadd.f32 %v2173_v13, %v418_v37  ;;  %v741_v39 = vsel %vm57_vm0, %v2193_v35, -inf }
 0x102   :  { %742 = vmax.xlane.f32.xlu1 %v741_v39  ;;  %739 = vmax.xlane.f32.xlu0 %v738_v40  ;;  %v2202_v42 = vmul.f32 %v424_v36, %v198_v31 }
 0x103   :  { %v1638_v43 = vpop.f32.mrb[14].mxu1  ;;  %v2205_v45 = vmul.f32 %v419_v38, %v193_v34 }
 0x104   :  { %v434_v46 = vadd.f32 %v1638_v43, %v2173_v13  ;;  %v428_v47 = vpop.f32.mrb[15].mxu1  ;;  %v750_v59 = vsel %vm57_vm0, %v2202_v42, -inf  ;;  %v1393_v43 = vld [vmem:[%s2678_s3 + $0x80] sm:$0xff] }
 0x105   :  { %v429_v48 = vadd.f32 %v2173_v13, %v428_v47  ;;  %v747_v50 = vsel %vm57_vm0, %v2205_v45, -inf  ;;  %v1395_v47 = vld [vmem:[%s2678_s3 + $0x90] sm:$0xff] }
 0x106   :  { %745 = vmax.xlane.f32.xlu1 %v744_v49  ;;  %748 = vmax.xlane.f32.xlu0 %v747_v50  ;;  %v2213_v51 = vmul.f32 %v434_v46, %v208_v41  ;;  %v1397_v50 = vld [vmem:[%s2678_s3 + $0xa0] sm:$0xff] }
 0x107   :  { %v1641_v52 = vpop.f32.mrb[16].mxu1  ;;  %v2215_v53 = vmul.f32 %v429_v48, %v203_v44  ;;  %v1394_v44 = vld [vmem:[%s2678_s3 + $0x88] sm:$0xff]  ;;  %v1396_v48 = vld [vmem:[%s2678_s3 + $0x98] sm:$0xff] }
 0x108   :  { %v444_v55 = vadd.f32 %v1641_v52, %v2173_v13  ;;  %v438_v56 = vpop.f32.mrb[17].mxu1  ;;  %v756_v9 = vsel %vm57_vm0, %v2213_v51, -inf  ;;  %v1803_v46 = vpack.c.bf16 %v1394_v44, %v1393_v43  ;;  %v1807_v49 = vpack.c.bf16 %v1396_v48, %v1395_v47  ;;  %v1398_v52 = vld [vmem:[%s2678_s3 + $0xa8] sm:$0xff] }
 0x109   :  { %v439_v58 = vadd.f32 %v2173_v13, %v438_v56  ;;  %v753_v60 = vsel %vm57_vm0, %v2215_v53, -inf  ;;  %v1400_v56 = vld [vmem:[%s2678_s3 + $0xb8] sm:$0xff] }
 0x10a   :  { %751 = vmax.xlane.f32.xlu1 %v750_v59  ;;  %754 = vmax.xlane.f32.xlu0 %v753_v60  ;;  %v2226_v61 = vmul.f32 %v444_v55, %v218_v54  ;;  %v1811_v54 = vpack.c.bf16 %v1398_v52, %v1397_v50  ;;  %v1399_v55 = vld [vmem:[%s2678_s3 + $0xb0] sm:$0xff]  ;;  %v478_v59 = vld [vmem:[%s2683_s2 + $0x8] sm:$0xff] }
 0x10b   :  { %v1644_v0 = vpop.f32.mrb[18].mxu1  ;;  %v2228_v62 = vmul.f32 %v439_v58, %v213_v57  ;;  %1804 = vmatprep.subr.bf16.mxu0 %v1803_v46  ;;  %v1815_v57 = vpack.c.bf16 %v1400_v56, %v1399_v55  ;;  %v477_v58 = vld [vmem:[%s2683_s2] sm:$0xff]  ;;  %v479_v60 = vld [vmem:[%s2683_s2 + $0x10] sm:$0xff] }
 0x10c   :  { %v454_v63 = vadd.f32 %v1644_v0, %v2173_v13  ;;  %v448_v4 = vpop.f32.mrb[19].mxu1  ;;  %v762_v24 = vsel %vm57_vm0, %v2226_v61, -inf  ;;  %1806 = vmatpush3.bf16.msra.mxu0 %v1803_v46  ;;  %1667 = vmatprep.mubr.msk.f32.mxu0 %vm57_vm0, %v477_v58  ;;  %v480_v0 = vld [vmem:[%s2683_s2 + $0x18] sm:$0xff] }
 0x10d   :  { %v449_v8 = vadd.f32 %v2173_v13, %v448_v4  ;;  %v759_v14 = vsel %vm57_vm0, %v2228_v62, -inf  ;;  %1808 = vmatprep.subr.bf16.mxu0 %v1807_v49  ;;  %v483_v4 = vld [vmem:[%s2683_s2 + $0x30] sm:$0xff] }
 0x10e   :  { %757 = vmax.xlane.f32.xlu1 %v756_v9  ;;  %760 = vmax.xlane.f32.xlu0 %v759_v14  ;;  %v2240_v15 = vmul.f32 %v454_v63, %v228_v1  ;;  %v481_v1 = vld [vmem:[%s2683_s2 + $0x20] sm:$0xff]  ;;  %v482_v63 = vld [vmem:[%s2683_s2 + $0x28] sm:$0xff] }
 0x10f   :  { %v1647_v16 = vpop.f32.mrb[20].mxu1  ;;  %v2242_v2 = vmul.f32 %v449_v8, %v223_v5  ;;  %v484_v5 = vld [vmem:[%s2683_s2 + $0x38] sm:$0xff]  ;;  %v485_v8 = vld [vmem:[%s2683_s2 + $0x40] sm:$0xff]  ;;  %v486_v9 = vld [vmem:[%s2683_s2 + $0x48] sm:$0xff] }
 0x110   :  { %v464_v18 = vadd.f32 %v1647_v16, %v2173_v13  ;;  %v458_v19 = vpop.f32.mrb[21].mxu1  ;;  %v768_v36 = vsel %vm57_vm0, %v2240_v15, -inf  ;;  %1810 = vmatpush3.bf16.msra.mxu0 %v1807_v49  ;;  %v711_v14 = vld [vmem:[%s2684_s6] sm:$0xff]  ;;  %v712_v16 = vld [vmem:[%s2684_s6 + $0x8] sm:$0xff] }
 0x111   :  { %v459_v22 = vadd.f32 %v2173_v13, %v458_v19  ;;  %v765_v6 = vsel %vm57_vm0, %v2242_v2, -inf  ;;  %1812 = vmatprep.subr.bf16.mxu0 %v1811_v54  ;;  %v489_v19 = vld [vmem:[%s2683_s2 + $0x60] sm:$0xff] }
 0x112   :  { %763 = vmax.xlane.f32.xlu1 %v762_v24  ;;  %766 = vmax.xlane.f32.xlu0 %v765_v6  ;;  %v2260_v25 = vmul.f32 %v464_v18, %v238_v17  ;;  %v487_v17 = vld [vmem:[%s2683_s2 + $0x50] sm:$0xff]  ;;  %v488_v18 = vld [vmem:[%s2683_s2 + $0x58] sm:$0xff] }
 0x113   :  { %v1650_v27 = vpop.f32.mrb[22].mxu1  ;;  %v2262_v28 = vmul.f32 %v459_v22, %v233_v3  ;;  %v1835_v3 = vpack.c.bf16 %v712_v16, %v711_v14  ;;  %v492_v22 = vld [vmem:[%s2683_s2 + $0x78] sm:$0xff] }
 0x114   :  { %v474_v30 = vadd.f32 %v1650_v27, %v2173_v13  ;;  %v468_v31 = vpop.f32.mrb[23].mxu1  ;;  %v774_v39 = vsel %vm57_vm0, %v2260_v25, -inf  ;;  %1814 = vmatpush3.bf16.msra.mxu0 %v1811_v54 }
 0x115   :  { %v469_v34 = vadd.f32 %v2173_v13, %v468_v31  ;;  %v771_v37 = vsel %vm57_vm0, %v2262_v28, -inf  ;;  %v710_v13 = vld [vmem:[%s2681_s5 + $0x38] sm:$0xff]  ;;  %1816 = vmatprep.subr.bf16.mxu0 %v1815_v57 }
 0x116   :  { %769 = vmax.xlane.f32.xlu1 %v768_v36  ;;  %772 = vmax.xlane.f32.xlu0 %v771_v37  ;;  %v2274_v38 = vmul.f32 %v474_v30, %v248_v29  ;;  %v1831_v40 = vpack.c.bf16 %v710_v13, %v709_v12 }
 0x117   :  { %v2276_v10 = vmul.f32 %v469_v34, %v243_v33 }
 0x118   :  { %1832 = vmatprep.subr.bf16.mxu1 %v1831_v40  ;;  %v780_v41 = vsel %vm57_vm0, %v2274_v38, -inf  ;;  %1818 = vmatpush3.bf16.msra.mxu0 %v1815_v57 }
 0x119   :  { %v777_v11 = vsel %vm57_vm0, %v2276_v10, -inf  ;;  %1834 = vmatpush3.bf16.msra.mxu1 %v1831_v40  ;;  %1836 = vmatprep.subr.bf16.mxu0 %v1835_v3 }
 0x11a   :  { %775 = vmax.xlane.f32.xlu1 %v774_v39  ;;  %778 = vmax.xlane.f32.xlu0 %v777_v11 }
 0x11b   :  { %1668 = vmatmul.mubr.msk.f32.vlgmr.msra.gmra.mrb[8].mxu0 %vm57_vm0, %v478_v59 }
 0x11c   :  { %1670 = vmatprep.mubr.msk.f32.mxu0 %vm57_vm0, %v479_v60  ;;  %1838 = vmatpush3.bf16.msra.mxu0 %v1835_v3 }
 0x11e   :  { %781 = vmax.xlane.f32.xlu1 %v780_v41 }
 0x11f   :  { %1671 = vmatmul.mubr.msk.f32.gmra.mrb[10].mxu0 %vm57_vm0, %v480_v0 }
 0x120   :  { %1673 = vmatprep.mubr.msk.f32.mxu0 %vm57_vm0, %v481_v1 }
 0x123   :  { %1674 = vmatmul.mubr.msk.f32.gmra.mrb[12].mxu0 %vm57_vm0, %v482_v63 }
 0x124   :  { %1676 = vmatprep.mubr.msk.f32.mxu0 %vm57_vm0, %v483_v4 }
 0x127   :  { %1677 = vmatmul.mubr.msk.f32.gmra.mrb[14].mxu0 %vm57_vm0, %v484_v5 }
 0x128   :  { %1679 = vmatprep.mubr.msk.f32.mxu0 %vm57_vm0, %v485_v8 }
 0x12b   :  { %1680 = vmatmul.mubr.msk.f32.gmra.mrb[16].mxu0 %vm57_vm0, %v486_v9 }
 0x12c   :  { %1682 = vmatprep.mubr.msk.f32.mxu0 %vm57_vm0, %v487_v17 }
 0x12f   :  { %1683 = vmatmul.mubr.msk.f32.gmra.mrb[18].mxu0 %vm57_vm0, %v488_v18 }
 0x130   :  { %1685 = vmatprep.mubr.msk.f32.mxu0 %vm57_vm0, %v489_v19 }
 0x133   :  { %1686 = vmatmul.mubr.msk.f32.gmra.mrb[20].mxu0 %vm57_vm0, %v490_v20 }
 0x134   :  { %1688 = vmatprep.mubr.msk.f32.mxu0 %vm57_vm0, %v491_v21 }
 0x137   :  { %1689 = vmatmul.mubr.msk.f32.gmra.mrb[22].mxu0 %vm57_vm0, %v492_v22 }
 0x18b   :  { %v737_v24 = vpop.xlane.xlu0 %736 }
 0x18c   :  { %v783_v6 = vsub.f32 %v2183_v26, %v737_v24  ;;  %v713_v24 = vld [vmem:[%s2684_s6 + $0x10] sm:$0xff] }
 0x18e   :  { %v799_v7 = vmul.f32 1.442695, %v783_v6  ;;  %v714_v6 = vld [vmem:[%s2684_s6 + $0x18] sm:$0xff] }
 0x18f   :  { %v743_v27 = vpop.xlane.xlu1 %742  ;;  %v740_v29 = vpop.xlane.xlu0 %739 }
 0x190   :  { %1859 = vpow2.f32 %v799_v7  ;;  %v785_v30 = vsub.f32 %v2193_v35, %v743_v27  ;;  %v784_v31 = vsub.f32 %v2180_v23, %v740_v29  ;;  %v1839_v7 = vpack.c.bf16 %v714_v6, %v713_v24  ;;  %v715_v27 = vld [vmem:[%s2684_s6 + $0x20] sm:$0xff]  ;;  %v716_v29 = vld [vmem:[%s2684_s6 + $0x28] sm:$0xff] }
 0x192   :  { %v803_v33 = vmul.f32 1.442695, %v785_v30  ;;  %v801_v34 = vmul.f32 1.442695, %v784_v31  ;;  %1840 = vmatprep.subr.bf16.mxu0 %v1839_v7  ;;  %v1843_v30 = vpack.c.bf16 %v716_v29, %v715_v27 }
 0x193   :  { %v746_v36 = vpop.xlane.xlu1 %745  ;;  %v749_v37 = vpop.xlane.xlu0 %748  ;;  %1842 = vmatpush3.bf16.msra.mxu0 %v1839_v7 }
 0x194   :  { %1861 = vpow2.f32 %v803_v33  ;;  %v786_v39 = vsub.f32 %v2190_v32, %v746_v36  ;;  %v787_v11 = vsub.f32 %v2205_v45, %v749_v37  ;;  %1844 = vmatprep.subr.bf16.mxu0 %v1843_v30  ;;  %v717_v33 = vld [vmem:[%s2684_s6 + $0x30] sm:$0xff] }
 0x195   :  { %1863 = vpow2.f32 %v801_v34  ;;  %v718_v34 = vld [vmem:[%s2684_s6 + $0x38] sm:$0xff] }
 0x196   :  { %v805_v12 = vmul.f32 1.442695, %v786_v39  ;;  %v807_v26 = vmul.f32 1.442695, %v787_v11  ;;  %v1847_v37 = vpack.c.bf16 %v718_v34, %v717_v33 }
 0x197   :  { %v752_v13 = vpop.xlane.xlu1 %751  ;;  %v755_v40 = vpop.xlane.xlu0 %754  ;;  %1846 = vmatpush3.bf16.msra.mxu0 %v1843_v30 }
 0x198   :  { %1865 = vpow2.f32 %v805_v12  ;;  %v788_v41 = vsub.f32 %v2202_v42, %v752_v13  ;;  %v789_v35 = vsub.f32 %v2215_v53, %v755_v40  ;;  %1848 = vmatprep.subr.bf16.mxu0 %v1847_v37 }
 0x199   :  { %1867 = vpow2.f32 %v807_v26 }
 0x19a   :  { %v2391_v23 = vpop.eup %1859  ;;  %v809_v43 = vmul.f32 1.442695, %v788_v41  ;;  %v811_v44 = vmul.f32 1.442695, %v789_v35 }
 0x19b   :  { %v758_v46 = vpop.xlane.xlu1 %757  ;;  %1707 = vmatprep.mubr.msk.f32.mxu1 %vm57_vm0, %v2391_v23  ;;  %v761_v32 = vpop.xlane.xlu0 %760  ;;  %1850 = vmatpush3.bf16.msra.mxu0 %v1847_v37 }
 0x19c   :  { %1869 = vpow2.f32 %v809_v43  ;;  %v790_v45 = vsub.f32 %v2213_v51, %v758_v46  ;;  %v791_v47 = vsub.f32 %v2228_v62, %v761_v32 }
 0x19d   :  { %1871 = vpow2.f32 %v811_v44 }
 0x19e   :  { %v2397_v48 = vpop.eup %1861  ;;  %v813_v42 = vmul.f32 1.442695, %v790_v45  ;;  %v815_v53 = vmul.f32 1.442695, %v791_v47 }
 0x19f   :  { %v2399_v49 = vpop.eup %1863  ;;  %v764_v50 = vpop.xlane.xlu1 %763 }
 0x1a0   :  { %v767_v52 = vpop.xlane.xlu0 %766  ;;  %1873 = vpow2.f32 %v813_v42  ;;  %v792_v54 = vsub.f32 %v2226_v61, %v764_v50  ;;  %1708 = vmatmul.mubr.msk.f32.vlgmr.msra.gmra.mrb[24].mxu1 %vm57_vm0, %v2399_v49 }
 0x1a1   :  { %v793_v55 = vsub.f32 %v2242_v2, %v767_v52  ;;  %1875 = vpow2.f32 %v815_v53  ;;  %1710 = vmatprep.mubr.msk.f32.mxu1 %vm57_vm0, %v2397_v48 }
 0x1a2   :  { %v2407_v51 = vpop.eup %1865  ;;  %v817_v62 = vmul.f32 1.442695, %v792_v54 }
 0x1a3   :  { %v819_v56 = vmul.f32 1.442695, %v793_v55  ;;  %v2409_v57 = vpop.eup %1867  ;;  %v770_v58 = vpop.xlane.xlu1 %769 }
 0x1a4   :  { %v773_v59 = vpop.xlane.xlu0 %772  ;;  %1877 = vpow2.f32 %v817_v62  ;;  %v794_v61 = vsub.f32 %v2240_v15, %v770_v58  ;;  %1711 = vmatmul.mubr.msk.f32.gmra.mrb[26].mxu1 %vm57_vm0, %v2407_v51 }
 0x1a5   :  { %v795_v2 = vsub.f32 %v2262_v28, %v773_v59  ;;  %1879 = vpow2.f32 %v819_v56  ;;  %1713 = vmatprep.mubr.msk.f32.mxu1 %vm57_vm0, %v2409_v57 }
 0x1a6   :  { %v2417_v60 = vpop.eup %1869  ;;  %v821_v0 = vmul.f32 1.442695, %v794_v61 }
 0x1a7   :  { %v823_v1 = vmul.f32 1.442695, %v795_v2  ;;  %v2419_v63 = vpop.eup %1871  ;;  %v776_v4 = vpop.xlane.xlu1 %775 }
 0x1a8   :  { %v779_v5 = vpop.xlane.xlu0 %778  ;;  %1881 = vpow2.f32 %v821_v0  ;;  %v796_v15 = vsub.f32 %v2260_v25, %v776_v4  ;;  %1714 = vmatmul.mubr.msk.f32.gmra.mrb[28].mxu1 %vm57_vm0, %v2417_v60 }
 0x1a9   :  { %v797_v28 = vsub.f32 %v2276_v10, %v779_v5  ;;  %1883 = vpow2.f32 %v823_v1  ;;  %1716 = vmatprep.mubr.msk.f32.mxu1 %vm57_vm0, %v2419_v63 }
 0x1aa   :  { %v2427_v8 = vpop.eup %1873  ;;  %v825_v9 = vmul.f32 1.442695, %v796_v15 }
 0x1ab   :  { %v827_v14 = vmul.f32 1.442695, %v797_v28  ;;  %v2429_v16 = vpop.eup %1875  ;;  %v782_v17 = vpop.xlane.xlu1 %781 }
 0x1ac   :  { %1885 = vpow2.f32 %v825_v9  ;;  %v798_v3 = vsub.f32 %v2274_v38, %v782_v17  ;;  %1717 = vmatmul.mubr.msk.f32.gmra.mrb[30].mxu1 %vm57_vm0, %v2427_v8  ;;  %v2516_v17 = vld [vmem:[%s2682_s4 + $0x2] ss:$0 sm:$0xff] }
 0x1ad   :  { %1887 = vpow2.f32 %v827_v14  ;;  %1719 = vmatprep.mubr.msk.f32.mxu1 %vm57_vm0, %v2429_v16 }
 0x1ae   :  { %v2436_v25 = vpop.eup %1877  ;;  %v829_v10 = vmul.f32 1.442695, %v798_v3 }
 0x1af   :  { %v2438_v18 = vpop.eup %1879 }
 0x1b0   :  { %1889 = vpow2.f32 %v829_v10  ;;  %1720 = vmatmul.mubr.msk.f32.gmra.mrb[32].mxu1 %vm57_vm0, %v2436_v25 }
 0x1b1   :  { %1722 = vmatprep.mubr.msk.f32.mxu1 %vm57_vm0, %v2438_v18 }
 0x1b2   :  { %v2444_v38 = vpop.eup %1881 }
 0x1b3   :  { %v2446_v19 = vpop.eup %1883 }
 0x1b4   :  { %1723 = vmatmul.mubr.msk.f32.gmra.mrb[34].mxu1 %vm57_vm0, %v2444_v38 }
 0x1b5   :  { %1725 = vmatprep.mubr.msk.f32.mxu1 %vm57_vm0, %v2446_v19 }
 0x1b6   :  { %v2452_v20 = vpop.eup %1885 }
 0x1b7   :  { %v2454_v21 = vpop.eup %1887 }
 0x1b8   :  { %1726 = vmatmul.mubr.msk.f32.gmra.mrb[36].mxu1 %vm57_vm0, %v2452_v20 }
 0x1b9   :  { %1728 = vmatprep.mubr.msk.f32.mxu1 %vm57_vm0, %v2454_v21 }
 0x1ba   :  { %v2460_v22 = vpop.eup %1889 }
 0x1bc   :  { %1729 = vmatmul.mubr.msk.f32.gmra.mrb[38].mxu1 %vm57_vm0, %v2460_v22 }
 0x1ee   :  { %v1669_v31 = vpop.f32.mrb[8].mxu0 }
 0x1ef   :  { %v624_v36 = vpop.f32.mrb[9].mxu0  ;;  %v630_v37 = vadd.f32 %v1669_v31, %v2516_v17 }
 0x1f2   :  { %v2482_v39 = vpop.f32.mrb[10].mxu0 }
 0x1f3   :  { %v2484_v11 = vpop.f32.mrb[11].mxu0 }
 0x1f6   :  { %v2486_v12 = vpop.f32.mrb[12].mxu0 }
 0x1f7   :  { %v2488_v26 = vpop.f32.mrb[13].mxu0 }
 0x1fa   :  { %v2490_v13 = vpop.f32.mrb[14].mxu0 }
 0x1fb   :  { %v2492_v40 = vpop.f32.mrb[15].mxu0 }
 0x1fe   :  { %v2494_v41 = vpop.f32.mrb[16].mxu0 }
 0x1ff   :  { %v2496_v35 = vpop.f32.mrb[17].mxu0 }
 0x202   :  { %v2498_v43 = vpop.f32.mrb[18].mxu0 }
 0x203   :  { %v2500_v44 = vpop.f32.mrb[19].mxu0 }
 0x206   :  { %v2502_v46 = vpop.f32.mrb[20].mxu0 }
 0x207   :  { %v2504_v32 = vpop.f32.mrb[21].mxu0 }
 0x20a   :  { %v2506_v45 = vpop.f32.mrb[22].mxu0 }
 0x20b   :  { %v2508_v47 = vpop.f32.mrb[23].mxu0 }
 0x273   :  { %v1709_v42 = vpop.f32.mrb[24].mxu1 }
 0x274   :  { %v1025_v53 = vmax.f32 %v1709_v42, 1e-30  ;;  %v945_v50 = vpop.f32.mrb[25].mxu1 }
 0x275   :  { %v1024_v52 = vmax.f32 %v945_v50, 1e-30  ;;  %v625_v50 = vadd.f32 %v2516_v17, %v624_v36  ;;  %v635_v36 = vadd.f32 %v2516_v17, %v2484_v11  ;;  %v650_v11 = vadd.f32 %v2486_v12, %v2516_v17 }
 0x276   :  { %1891 = vrcp.f32 %v1025_v53 }
 0x277   :  { %1893 = vrcp.f32 %v1024_v52  ;;  %v1712_v54 = vpop.f32.mrb[26].mxu1 }
 0x278   :  { %v1027_v55 = vmax.f32 %v1712_v54, 1e-30  ;;  %v955_v62 = vpop.f32.mrb[27].mxu1 }
 0x279   :  { %v1026_v56 = vmax.f32 %v955_v62, 1e-30 }
 0x27a   :  { %1895 = vrcp.f32 %v1027_v55 }
 0x27b   :  { %1897 = vrcp.f32 %v1026_v56  ;;  %v1715_v58 = vpop.f32.mrb[28].mxu1 }
 0x27c   :  { %v1029_v59 = vmax.f32 %v1715_v58, 1e-30  ;;  %v965_v61 = vpop.f32.mrb[29].mxu1 }
 0x27d   :  { %v1028_v2 = vmax.f32 %v965_v61, 1e-30 }
 0x27e   :  { %1899 = vrcp.f32 %v1029_v59 }
 0x27f   :  { %1901 = vrcp.f32 %v1028_v2  ;;  %v1718_v0 = vpop.f32.mrb[30].mxu1 }
 0x280   :  { %v1892_v1 = vpop.eup %1891  ;;  %v1031_v4 = vmax.f32 %v1718_v0, 1e-30  ;;  %v2510_v5 = vpop.f32.mrb[31].mxu1 }
 0x281   :  { %v1894_v15 = vpop.eup %1893  ;;  %v1057_v28 = vmul.f32 %v1892_v1, %v1025_v53  ;;  %v1030_v9 = vmax.f32 %v2510_v5, 1e-30 }
 0x282   :  { %v1056_v14 = vmul.f32 %v1894_v15, %v1024_v52  ;;  %1903 = vrcp.f32 %v1031_v4 }
 0x283   :  { %v1073_v3 = vsub.f32 2.0, %v1057_v28  ;;  %1905 = vrcp.f32 %v1030_v9  ;;  %v2518_v10 = vpop.f32.mrb[32].mxu1 }
 0x284   :  { %v1896_v24 = vpop.eup %1895  ;;  %v1072_v6 = vsub.f32 2.0, %v1056_v14  ;;  %v1033_v7 = vmax.f32 %v2518_v10, 1e-30  ;;  %v2521_v27 = vpop.f32.mrb[33].mxu1 }
 0x285   :  { %v1898_v29 = vpop.eup %1897  ;;  %v1089_v30 = vmul.f32 %v1892_v1, %v1073_v3  ;;  %v1059_v33 = vmul.f32 %v1896_v24, %v1027_v55  ;;  %v1032_v34 = vmax.f32 %v2521_v27, 1e-30  ;;  %v640_v55 = vadd.f32 %v2482_v39, %v2516_v17 }
 0x286   :  { %v1088_v42 = vmul.f32 %v1894_v15, %v1072_v6  ;;  %v1058_v53 = vmul.f32 %v1898_v29, %v1026_v56  ;;  %1907 = vrcp.f32 %v1033_v7  ;;  %v670_v27 = vadd.f32 %v2494_v41, %v2516_v17 }
 0x287   :  { %v1075_v52 = vsub.f32 2.0, %v1059_v33  ;;  %1909 = vrcp.f32 %v1032_v34  ;;  %v1105_v54 = vmul.f32 %v2399_v49, %v1089_v30  ;;  %v2531_v62 = vpop.f32.mrb[34].mxu1 }
 0x288   :  { %v1900_v58 = vpop.eup %1899  ;;  %v1074_v31 = vsub.f32 2.0, %v1058_v53  ;;  %v1104_v56 = vmul.f32 %v2391_v23, %v1088_v42  ;;  %v1035_v61 = vmax.f32 %v2531_v62, 1e-30  ;;  %v2537_v0 = vpop.f32.mrb[35].mxu1 }
 0x289   :  { %v1902_v1 = vpop.eup %1901  ;;  %v1091_v5 = vmul.f32 %v1896_v24, %v1075_v52  ;;  %v1061_v15 = vmul.f32 %v1900_v58, %v1029_v59  ;;  %v1121_v49 = vmul.f32 %v1105_v54, %v630_v37  ;;  %v1034_v28 = vmax.f32 %v2537_v0, 1e-30 }
 0x28a   :  { %v1090_v14 = vmul.f32 %v1898_v29, %v1074_v31  ;;  %v1060_v3 = vmul.f32 %v1902_v1, %v1028_v2  ;;  %v1120_v39 = vmul.f32 %v1104_v56, %v625_v50  ;;  %1911 = vrcp.f32 %v1035_v61 }
 0x28b   :  { %v1077_v23 = vsub.f32 2.0, %v1061_v15  ;;  %1913 = vrcp.f32 %v1034_v28  ;;  %v1107_v6 = vmul.f32 %v2407_v51, %v1091_v5  ;;  %v2547_v30 = vpop.f32.mrb[36].mxu1  ;;  %v645_v37 = vadd.f32 %v2516_v17, %v2488_v26 }
 0x28c   :  { %v1904_v59 = vpop.eup %1903  ;;  %v1076_v24 = vsub.f32 2.0, %v1060_v3  ;;  %v1106_v29 = vmul.f32 %v2397_v48, %v1090_v14  ;;  %v1037_v2 = vmax.f32 %v2547_v30, 1e-30  ;;  %v2553_v33 = vpop.f32.mrb[37].mxu1  ;;  %1747 = vmatprep.mubr.msk.f32.mxu0 %vm57_vm0, %v1120_v39  ;;  %v660_v26 = vadd.f32 %v2490_v13, %v2516_v17 }
 0x28d   :  { %v1906_v42 = vpop.eup %1905  ;;  %v1093_v51 = vmul.f32 %v1900_v58, %v1077_v23  ;;  %v1063_v53 = vmul.f32 %v1904_v59, %v1031_v4  ;;  %v1123_v50 = vmul.f32 %v1107_v6, %v640_v55  ;;  %v1036_v52 = vmax.f32 %v2553_v33, 1e-30  ;;  %1748 = vmatmul.mubr.msk.f32.vlgmr.msra.gmra.mrb[24].mxu0 %vm57_vm0, %v1121_v49 }
 0x28e   :  { %v1092_v12 = vmul.f32 %v1902_v1, %v1076_v24  ;;  %v1062_v54 = vmul.f32 %v1906_v42, %v1030_v9  ;;  %v1122_v48 = vmul.f32 %v1106_v29, %v635_v36  ;;  %1915 = vrcp.f32 %v1037_v2 }
 0x28f   :  { %v1079_v31 = vsub.f32 2.0, %v1063_v53  ;;  %1917 = vrcp.f32 %v1036_v52  ;;  %v1109_v56 = vmul.f32 %v2417_v60, %v1093_v51  ;;  %v1730_v5 = vpop.f32.mrb[38].mxu1  ;;  %v655_v9 = vadd.f32 %v2516_v17, %v2492_v40 }
 0x290   :  { %v1908_v15 = vpop.eup %1907  ;;  %v1078_v58 = vsub.f32 2.0, %v1062_v54  ;;  %v1108_v4 = vmul.f32 %v2409_v57, %v1092_v12  ;;  %v1039_v55 = vmax.f32 %v1730_v5, 1e-30  ;;  %v1015_v14 = vpop.f32.mrb[39].mxu1  ;;  %1750 = vmatprep.mubr.msk.f32.mxu0 %vm57_vm0, %v1122_v48  ;;  %v680_v0 = vadd.f32 %v2498_v43, %v2516_v17 }
 0x291   :  { %v1910_v36 = vpop.eup %1909  ;;  %v1095_v1 = vmul.f32 %v1904_v59, %v1079_v31  ;;  %v1065_v60 = vmul.f32 %v1908_v15, %v1033_v7  ;;  %v1125_v49 = vmul.f32 %v1109_v56, %v650_v11  ;;  %v1038_v3 = vmax.f32 %v1015_v14, 1e-30  ;;  %1751 = vmatmul.mubr.msk.f32.gmra.mrb[26].mxu0 %vm57_vm0, %v1123_v50 }
 0x292   :  { %v1094_v13 = vmul.f32 %v1906_v42, %v1078_v58  ;;  %v1064_v57 = vmul.f32 %v1910_v36, %v1032_v34  ;;  %v1124_v39 = vmul.f32 %v1108_v4, %v645_v37  ;;  %1919 = vrcp.f32 %v1039_v55 }
 0x293   :  { %v1081_v23 = vsub.f32 2.0, %v1065_v60  ;;  %1921 = vrcp.f32 %v1038_v3  ;;  %v1111_v6 = vmul.f32 %v2427_v8, %v1095_v1  ;;  %v690_v43 = vadd.f32 %v2502_v46, %v2516_v17 }
 0x294   :  { %v1912_v40 = vpop.eup %1911  ;;  %v1080_v30 = vsub.f32 2.0, %v1064_v57  ;;  %v1110_v59 = vmul.f32 %v2419_v63, %v1094_v13  ;;  %1753 = vmatprep.mubr.msk.f32.mxu0 %vm57_vm0, %v1124_v39  ;;  %v665_v63 = vadd.f32 %v2516_v17, %v2496_v35  ;;  %v700_v46 = vadd.f32 %v2506_v45, %v2516_v17 }
 0x295   :  { %v1914_v10 = vpop.eup %1913  ;;  %v1097_v7 = vmul.f32 %v1908_v15, %v1081_v23  ;;  %v1067_v11 = vmul.f32 %v1912_v40, %v1035_v61  ;;  %v1127_v24 = vmul.f32 %v1111_v6, %v660_v26  ;;  %1754 = vmatmul.mubr.msk.f32.gmra.mrb[28].mxu0 %vm57_vm0, %v1125_v49 }
 0x296   :  { %v1096_v34 = vmul.f32 %v1910_v36, %v1080_v30  ;;  %v1066_v8 = vmul.f32 %v1914_v10, %v1034_v28  ;;  %v1126_v29 = vmul.f32 %v1110_v59, %v655_v9 }
 0x297   :  { %v1083_v33 = vsub.f32 2.0, %v1067_v11  ;;  %v1113_v37 = vmul.f32 %v2436_v25, %v1097_v7  ;;  %v675_v25 = vadd.f32 %v2516_v17, %v2500_v44 }
 0x298   :  { %v1916_v42 = vpop.eup %1915  ;;  %v1082_v62 = vsub.f32 2.0, %v1066_v8  ;;  %v1112_v61 = vmul.f32 %v2429_v16, %v1096_v34  ;;  %1756 = vmatprep.mubr.msk.f32.mxu0 %vm57_vm0, %v1126_v29 }
 0x299   :  { %v1918_v51 = vpop.eup %1917  ;;  %v1099_v53 = vmul.f32 %v1912_v40, %v1083_v33  ;;  %v1069_v41 = vmul.f32 %v1916_v42, %v1037_v2  ;;  %v1129_v50 = vmul.f32 %v1113_v37, %v670_v27  ;;  %1757 = vmatmul.mubr.msk.f32.gmra.mrb[30].mxu0 %vm57_vm0, %v1127_v24 }
 0x29a   :  { %v1098_v28 = vmul.f32 %v1914_v10, %v1082_v62  ;;  %v1068_v35 = vmul.f32 %v1918_v51, %v1036_v52  ;;  %v1128_v12 = vmul.f32 %v1112_v61, %v665_v63 }
 0x29b   :  { %v1085_v54 = vsub.f32 2.0, %v1069_v41  ;;  %v1115_v16 = vmul.f32 %v2444_v38, %v1099_v53  ;;  %v685_v38 = vadd.f32 %v2516_v17, %v2504_v32  ;;  %v695_v32 = vadd.f32 %v2516_v17, %v2508_v47 }
 0x29c   :  { %v1920_v48 = vpop.eup %1919  ;;  %v1084_v31 = vsub.f32 2.0, %v1068_v35  ;;  %v1114_v56 = vmul.f32 %v2438_v18, %v1098_v28  ;;  %1759 = vmatprep.mubr.msk.f32.mxu0 %vm57_vm0, %v1128_v12 }
 0x29d   :  { %v1922_v2 = vpop.eup %1921  ;;  %v1101_v5 = vmul.f32 %v1916_v42, %v1085_v54  ;;  %v1071_v26 = vmul.f32 %v1920_v48, %v1039_v55  ;;  %v1131_v15 = vmul.f32 %v1115_v16, %v680_v0  ;;  %1760 = vmatmul.mubr.msk.f32.gmra.mrb[32].mxu0 %vm57_vm0, %v1129_v50 }
 0x29e   :  { %v1100_v52 = vmul.f32 %v1918_v51, %v1084_v31  ;;  %v1070_v44 = vmul.f32 %v1922_v2, %v1038_v3  ;;  %v1130_v58 = vmul.f32 %v1114_v56, %v675_v25 }
 0x29f   :  { %v1087_v4 = vsub.f32 2.0, %v1071_v26  ;;  %v1117_v18 = vmul.f32 %v2452_v20, %v1101_v5 }
 0x2a0   :  { %v1086_v14 = vsub.f32 2.0, %v1070_v44  ;;  %v1116_v9 = vmul.f32 %v2446_v19, %v1100_v52  ;;  %1762 = vmatprep.mubr.msk.f32.mxu0 %vm57_vm0, %v1130_v58 }
 0x2a1   :  { %v1103_v55 = vmul.f32 %v1920_v48, %v1087_v4  ;;  %v1133_v36 = vmul.f32 %v1117_v18, %v690_v43  ;;  %1763 = vmatmul.mubr.msk.f32.gmra.mrb[34].mxu0 %vm57_vm0, %v1131_v15 }
 0x2a2   :  { %v1102_v1 = vmul.f32 %v1922_v2, %v1086_v14  ;;  %v1132_v60 = vmul.f32 %v1116_v9, %v685_v38 }
 0x2a3   :  { %v1119_v49 = vmul.f32 %v2460_v22, %v1103_v55 }
 0x2a4   :  { %v1118_v20 = vmul.f32 %v2454_v21, %v1102_v1  ;;  %1765 = vmatprep.mubr.msk.f32.mxu0 %vm57_vm0, %v1132_v60 }
 0x2a5   :  { %v1135_v19 = vmul.f32 %v1119_v49, %v700_v46  ;;  %1766 = vmatmul.mubr.msk.f32.gmra.mrb[36].mxu0 %vm57_vm0, %v1133_v36 }
 0x2a6   :  { %v1134_v3 = vmul.f32 %v1118_v20, %v695_v32 }
 0x2a8   :  { %1768 = vmatprep.mubr.msk.f32.mxu0 %vm57_vm0, %v1134_v3 }
 0x2a9   :  { %1769 = vmatmul.mubr.msk.f32.gmra.mrb[38].mxu0 %vm57_vm0, %v1135_v19 }
 0x360   :  { %v1749_v45 = vpop.f32.mrb[24].mxu0 }
 0x361   :  { %1331 = vst.msk [vmem:[%s2685_s7 + $0x8] sm:$0xff] %vm1329_vm1, %v1749_v45  ;;  %v1250_v22 = vpop.f32.mrb[25].mxu0 }
 0x362   :  { %1330 = vst.msk [vmem:[%s2685_s7] sm:$0xff] %vm1329_vm1, %v1250_v22 }
 0x364   :  { %v1752_v21 = vpop.f32.mrb[26].mxu0 }
 0x365   :  { %1333 = vst.msk [vmem:[%s2685_s7 + $0x18] sm:$0xff] %vm1329_vm1, %v1752_v21  ;;  %v1260_v47 = vpop.f32.mrb[27].mxu0 }
 0x366   :  { %1332 = vst.msk [vmem:[%s2685_s7 + $0x10] sm:$0xff] %vm1329_vm1, %v1260_v47 }
 0x368   :  { %v1755_v17 = vpop.f32.mrb[28].mxu0 }
 0x369   :  { %1335 = vst.msk [vmem:[%s2685_s7 + $0x28] sm:$0xff] %vm1329_vm1, %v1755_v17  ;;  %v1270_v13 = vpop.f32.mrb[29].mxu0 }
 0x36a   :  { %1334 = vst.msk [vmem:[%s2685_s7 + $0x20] sm:$0xff] %vm1329_vm1, %v1270_v13 }
 0x36c   :  { %v1758_v57 = vpop.f32.mrb[30].mxu0 }
 0x36d   :  { %1337 = vst.msk [vmem:[%s2685_s7 + $0x38] sm:$0xff] %vm1329_vm1, %v1758_v57  ;;  %v1280_v39 = vpop.f32.mrb[31].mxu0 }
 0x36e   :  { %1336 = vst.msk [vmem:[%s2685_s7 + $0x30] sm:$0xff] %vm1329_vm1, %v1280_v39 }
 0x370   :  { %v1761_v23 = vpop.f32.mrb[32].mxu0 }
 0x371   :  { %1339 = vst.msk [vmem:[%s2685_s7 + $0x48] sm:$0xff] %vm1329_vm1, %v1761_v23  ;;  %v1290_v6 = vpop.f32.mrb[33].mxu0 }
 0x372   :  { %1338 = vst.msk [vmem:[%s2685_s7 + $0x40] sm:$0xff] %vm1329_vm1, %v1290_v6 }
 0x374   :  { %v1764_v40 = vpop.f32.mrb[34].mxu0 }
 0x375   :  { %1341 = vst.msk [vmem:[%s2685_s7 + $0x58] sm:$0xff] %vm1329_vm1, %v1764_v40  ;;  %v1300_v30 = vpop.f32.mrb[35].mxu0 }
 0x376   :  { %1340 = vst.msk [vmem:[%s2685_s7 + $0x50] sm:$0xff] %vm1329_vm1, %v1300_v30 }
 0x378   :  { %v1767_v59 = vpop.f32.mrb[36].mxu0 }
 0x379   :  { %1343 = vst.msk [vmem:[%s2685_s7 + $0x68] sm:$0xff] %vm1329_vm1, %v1767_v59  ;;  %v1310_v10 = vpop.f32.mrb[37].mxu0 }
 0x37a   :  { %1342 = vst.msk [vmem:[%s2685_s7 + $0x60] sm:$0xff] %vm1329_vm1, %v1310_v10 }
 0x37c   :  { %v1770_v7 = vpop.f32.mrb[38].mxu0 }
 0x37d   :  { %1345 = vst.msk [vmem:[%s2685_s7 + $0x78] sm:$0xff] %vm1329_vm1, %v1770_v7  ;;  %v1320_v11 = vpop.f32.mrb[39].mxu0 }
 0x37e   :  { %1344 = vst.msk [vmem:[%s2685_s7 + $0x70] sm:$0xff] %vm1329_vm1, %v1320_v11 }

</bundles_post_ra>
